<compile_context>
chip_gen: v7x
topology: tpu7x:2x2x1
jax: 0.10.0
libtpu: 0.0.40
codegen_flags: <defaults>
</compile_context>

<pallas_src>
import jax
import jax.numpy as jnp
from jax import lax
from jax.experimental import pallas as pl
from jax.experimental.pallas import tpu as pltpu


def _interp_matrix(out_size: int, in_size: int):
    """Row-stochastic matrix M (out_size, in_size) so that M @ v is the
    align_corners=True bilinear resample of v along one axis (f32)."""
    if out_size == 1:
        src = jnp.zeros((1,), jnp.float32)
    else:
        scale = (in_size - 1) / (out_size - 1) if in_size > 1 else 0.0
        src = jnp.arange(out_size, dtype=jnp.float32) * scale
    i0 = jnp.clip(jnp.floor(src).astype(jnp.int32), 0, in_size - 1)
    i1 = jnp.clip(i0 + 1, 0, in_size - 1)
    frac = src - i0.astype(jnp.float32)
    m = (jax.nn.one_hot(i0, in_size, dtype=jnp.float32) * (1.0 - frac)[:, None]
         + jax.nn.one_hot(i1, in_size, dtype=jnp.float32) * frac[:, None])
    return m


def _upsample_kernel(x_ref, wh_ref, wwt_ref, o_ref):
    # x_ref:   (TB, H_in, W_in)  TB flattened (batch*channel) planes, compute dtype
    # wh_ref:  (TH, H_in)        row-interp matrix tile (TH rows of H_out)
    # wwt_ref: (W_in, W_out)     column-interp matrix (transposed)
    # o_ref:   (TB, TH, W_out)   output block, stored in the original dtype
    tb, h_in, w_in = x_ref.shape
    th = wh_ref.shape[0]
    w_out = wwt_ref.shape[1]

    x = x_ref[...]
    wh = wh_ref[...]
    wwt = wwt_ref[...]

    # 1) Height interpolation FIRST, on the small pre-upsample planes: a single
    #    batched (TH, H_in) @ (H_in, W_in) contraction over the TB planes,
    #    f32 accumulation on the MXU.
    wh_b = jnp.broadcast_to(wh[None], (tb, th, h_in))
    tmp = lax.dot_general(
        wh_b, x,
        dimension_numbers=(((2,), (1,)), ((0,), (0,))),
        preferred_element_type=jnp.float32)                  # (TB, TH, W_in) f32
    tmp = tmp.astype(wwt.dtype)

    # 2) Width interpolation as ONE large lane-dense (N = W_out) matmul whose
    #    result IS the output block -> single contiguous (TB*TH, W_out) store.
    out = jnp.dot(tmp.reshape(tb * th, w_in), wwt,
                  preferred_element_type=jnp.float32)         # (TB*TH, W_out)
    o_ref[...] = out.reshape(tb, th, w_out).astype(o_ref.dtype)


def _vmem_capacity_bytes():
    """Physical VMEM of the current generation (v5e/v6e: 128 MiB, v7x: 64 MiB),
    with a conservative 64 MiB fallback if the query is unavailable."""
    try:
        return int(pltpu.get_tpu_info().vmem_capacity_bytes)
    except Exception:
        return 64 * 1024 * 1024


def _round_down_16(v):
    return max(16, (v // 16) * 16)


def _plan_tiles(n_planes, h_in, w_in, h_out, w_out, cbytes, obytes, budget,
                max_planes_per_block=None, max_rows_per_block=None):
    """Pick (TB, TH): planes per block and H_out rows per block.

    Counts every VMEM resident: double-buffered input/output blocks, the
    (double-buffered) wh/wwt buffers, the broadcast wh, the f32 height-interp
    intermediate plus its compute-dtype copy, and the f32 width-interp result
    plus its store-dtype copy."""

    def total_bytes(tb, th):
        fixed = (2 * w_in * w_out * cbytes          # wwt (double-buffered)
                 + 2 * th * h_in * cbytes)          # wh tile (double-buffered)
        per_plane = (2 * h_in * w_in * cbytes       # input block (double-buffered)
                     + 2 * th * w_out * obytes      # output block (double-buffered)
                     + th * h_in * cbytes           # broadcast wh
                     + th * w_in * (4 + cbytes)     # f32 tmp + compute-dtype copy
                     + th * w_out * (4 + obytes))   # f32 result + store-dtype copy
        return fixed + tb * per_plane

    # Tile H_out (multiples of 16 so f32/bf16 sublane tiling stays aligned)
    # until at least a single-plane block fits the budget.
    th = h_out
    while th > 16 and total_bytes(1, th) > budget:
        nxt = _round_down_16(th // 2)
        if nxt >= th:
            break
        th = nxt
    if max_rows_per_block is not None and h_out > 16 and max_rows_per_block < h_out:
        th = min(th, _round_down_16(max_rows_per_block))

    # Largest plane count that fits the remaining budget.
    fixed = total_bytes(0, th)
    per_plane = total_bytes(1, th) - fixed
    if per_plane <= 0:
        tb = n_planes
    else:
        tb = int(max(1, (budget - fixed) // per_plane))
    tb = max(1, min(tb, n_planes, 512))
    if max_planes_per_block is not None:
        tb = max(1, min(tb, max_planes_per_block))
    return tb, th


def bilinear_upsample_pallas(x, out_h, out_w, *,
                             max_planes_per_block=None, max_rows_per_block=None):
    """x: (B, C, H_in, W_in) -> (B, C, out_h, out_w), align_corners=True."""
    B, C, H_in, W_in = x.shape
    dtype = x.dtype
    n_planes = B * C

    # Feed bf16/f32 straight to the MXU; promote anything exotic to f32.
    if dtype in (jnp.dtype(jnp.bfloat16), jnp.dtype(jnp.float32)):
        compute_dtype = dtype
    else:
        compute_dtype = jnp.dtype(jnp.float32)
    # TODO(synk): on v5e, f32 inputs would prefer bf16 MXU operands (lower f32
    # MXU roof); kept f32 here to preserve reference-level accuracy.

    wh = _interp_matrix(out_h, H_in).astype(compute_dtype)       # (H_out, H_in)
    wwt = _interp_matrix(out_w, W_in).T.astype(compute_dtype)    # (W_in, W_out)

    x_flat = x.reshape(n_planes, H_in, W_in)
    if x_flat.dtype != compute_dtype:
        x_flat = x_flat.astype(compute_dtype)

    cbytes = jnp.dtype(compute_dtype).itemsize
    obytes = jnp.dtype(dtype).itemsize

    # Generation-aware VMEM budgeting: ~80% of physical VMEM as the compiler
    # limit (~51 MiB on v7x, ~102 MiB on v5e/v6e); blocks planned against ~90%
    # of that limit to leave headroom for compiler scratch.
    vmem_cap = _vmem_capacity_bytes()
    vmem_limit = max(32 * 1024 * 1024, int(vmem_cap * 0.8))
    block_budget = int(vmem_limit * 0.9)

    tb, th = _plan_tiles(n_planes, H_in, W_in, out_h, out_w, cbytes, obytes,
                         block_budget, max_planes_per_block, max_rows_per_block)

    # cdiv grid: ragged last blocks are handled by Pallas, so prime/odd B*C or
    # non-divisible H_out never collapse the block size.
    grid = (pl.cdiv(n_planes, tb), pl.cdiv(out_h, th))

    flops = 2 * n_planes * (out_h * H_in * W_in + out_h * W_in * out_w)
    bytes_accessed = (n_planes * H_in * W_in * cbytes          # input, read once per plane
                      + n_planes * out_h * out_w * obytes      # output, written once
                      + grid[0] * out_h * H_in * cbytes        # wh, re-read per plane block
                      + W_in * out_w * cbytes)                 # wwt, read once
    cost = pl.CostEstimate(flops=flops, transcendentals=0,
                           bytes_accessed=bytes_accessed)

    out_flat = pl.pallas_call(
        _upsample_kernel,
        out_shape=jax.ShapeDtypeStruct((n_planes, out_h, out_w), dtype),
        grid_spec=pltpu.PrefetchScalarGridSpec(
            num_scalar_prefetch=0,
            grid=grid,
            in_specs=[
                # h (inner grid axis) does not change the x block index, so the
                # input plane block is DMA'd once per plane block, not per row tile.
                pl.BlockSpec((tb, H_in, W_in), lambda p, h: (p, 0, 0)),
                pl.BlockSpec((th, H_in), lambda p, h: (h, 0)),
                pl.BlockSpec((W_in, out_w), lambda p, h: (0, 0)),
            ],
            out_specs=pl.BlockSpec((tb, th, out_w), lambda p, h: (p, h, 0)),
        ),
        compiler_params=pltpu.CompilerParams(
            dimension_semantics=("parallel", "parallel"),
            vmem_limit_bytes=vmem_limit,
        ),
        cost_estimate=cost,
    )(x_flat, wh, wwt)

    return out_flat.reshape(B, C, out_h, out_w)


class UpsamplePredictor:
    """JAX/Pallas port of the PyTorch UpsamplePredictor module."""

    def __init__(self, in_channels, num_classes):
        if isinstance(in_channels, list):
            in_channels = in_channels[-1]
        self.out_channels = [num_classes]
        self.num_classes = num_classes
        # Module has no learnable parameters.

    def forward(self, input: dict, target) -> dict:
        assert isinstance(input, dict)
        out_h, out_w = target.shape[2], target.shape[3]
        # Matches PyTorch semantics: the input dict is updated in place.
        for key in input:
            if 'logits' in key:
                input[key] = bilinear_upsample_pallas(input[key], out_h, out_w)
        return input


def _reference_upsample(x, out_h, out_w):
    """Pure-JAX reference of align_corners=True bilinear resize (same math)."""
    B, C, H_in, W_in = x.shape
    wh = _interp_matrix(out_h, H_in)
    ww = _interp_matrix(out_w, W_in)
    return jnp.einsum('oh,bchw,pw->bcop', wh, x.astype(jnp.float32), ww)


if __name__ == "__main__":
    key = jax.random.PRNGKey(0)
    k1, k2, k3, k4 = jax.random.split(key, 4)

    # --- Test 1: module forward, f32, small shapes -------------------------
    B, num_classes, H_in, W_in = 2, 4, 8, 8
    H_t, W_t = 16, 16

    logits = jax.random.normal(k1, (B, num_classes, H_in, W_in), jnp.float32)
    aux = jax.random.normal(k2, (B, num_classes, H_in, W_in), jnp.float32)
    target = jax.random.normal(k3, (B, 3, H_t, W_t), jnp.float32)

    predictor = UpsamplePredictor(in_channels=[16, 32], num_classes=num_classes)
    inputs = {'seg_logits': logits, 'aux_feature': aux}
    out = predictor.forward(inputs, target)
    jax.block_until_ready(out['seg_logits'])

    assert out['seg_logits'].shape == (B, num_classes, H_t, W_t)
    assert out['seg_logits'].dtype == logits.dtype
    assert out['aux_feature'].shape == (B, num_classes, H_in, W_in)
    ref = _reference_upsample(logits, H_t, W_t)
    assert jnp.allclose(out['seg_logits'], ref, atol=1e-5, rtol=1e-5)

    # --- Test 2: bf16 input (dtype preserved; tolerance-aware check) -------
    logits_bf16 = logits.astype(jnp.bfloat16)
    out_bf16 = bilinear_upsample_pallas(logits_bf16, H_t, W_t)
    jax.block_until_ready(out_bf16)
    assert out_bf16.dtype == jnp.bfloat16
    ref_bf16 = _reference_upsample(logits_bf16, H_t, W_t)
    assert jnp.allclose(out_bf16.astype(jnp.float32), ref_bf16,
                        atol=6e-2, rtol=6e-2)

    # --- Test 3: forced tiling exercises cdiv / ragged blocks on both axes -
    x3 = jax.random.normal(k4, (1, 7, 8, 8), jnp.float32)    # 7 planes (prime)
    out3 = bilinear_upsample_pallas(x3, 40, 48,
                                    max_planes_per_block=3,   # plane blocks 3,3,1
                                    max_rows_per_block=16)    # row blocks 16,16,8
    jax.block_until_ready(out3)
    ref3 = _reference_upsample(x3, 40, 48)
    assert out3.shape == (1, 7, 40, 48)
    assert jnp.allclose(out3, ref3, atol=1e-5, rtol=1e-5)

    print("KERNEL_OK")
</pallas_src>

<mosaic_0001>
module attributes {stable_mosaic.version = 11 : i64} {
  func.func @_upsample_kernel(%arg0: i32, %arg1: i32, %arg2: memref<8x8x8xf32, #tpu.memory_space<vmem>>, %arg3: memref<16x8xf32, #tpu.memory_space<vmem>>, %arg4: memref<8x16xf32, #tpu.memory_space<vmem>>, %arg5: memref<8x16x16xf32, #tpu.memory_space<vmem>>) attributes {dimension_semantics = [#tpu.dimension_semantics<parallel>, #tpu.dimension_semantics<parallel>], iteration_bounds = array<i64: 1, 1>, scalar_prefetch = 0 : i64, scratch_operands = 0 : i64, tpu.core_type = #tpu.core_type<tc>, window_params = [{transform_indices = @transform_0, window_bounds = array<i64: 8, 8, 8>}, {transform_indices = @transform_1, window_bounds = array<i64: 16, 8>}, {pipeline_mode = #tpu.pipeline_mode<synchronous>, transform_indices = @transform_2, window_bounds = array<i64: 8, 16>}, {transform_indices = @transform_3, window_bounds = array<i64: 8, 16, 16>}]} {
    %c0 = arith.constant 0 : index
    %c0_0 = arith.constant 0 : index
    %c0_1 = arith.constant 0 : index
    %0 = vector.load %arg2[%c0, %c0_0, %c0_1] : memref<8x8x8xf32, #tpu.memory_space<vmem>>, vector<8x8x8xf32>
    %c0_2 = arith.constant 0 : index
    %c0_3 = arith.constant 0 : index
    %1 = vector.load %arg3[%c0_2, %c0_3] : memref<16x8xf32, #tpu.memory_space<vmem>>, vector<16x8xf32>
    %c0_4 = arith.constant 0 : index
    %c0_5 = arith.constant 0 : index
    %2 = vector.load %arg4[%c0_4, %c0_5] : memref<8x16xf32, #tpu.memory_space<vmem>>, vector<8x16xf32>
    %3 = vector.shape_cast %1 : vector<16x8xf32> to vector<1x16x8xf32>
    %4 = vector.shape_cast %3 : vector<1x16x8xf32> to vector<1x16x8xf32>
    %5 = vector.broadcast %4 : vector<1x16x8xf32> to vector<8x16x8xf32>
    %cst = arith.constant dense<0.000000e+00> : vector<8x16x8xf32>
    %6 = tpu.matmul %5, %0, %cst {dimension_numbers = #tpu.dot_dimension_numbers<[2], [1], [1], [2], [0, 0, 0, 1, 1, 2], [0], [0]>} : vector<8x16x8xf32>, vector<8x8x8xf32>, vector<8x16x8xf32> -> vector<8x16x8xf32>
    %7 = vector.shape_cast %6 : vector<8x16x8xf32> to vector<128x8xf32>
    %cst_6 = arith.constant dense<0.000000e+00> : vector<128x16xf32>
    %8 = tpu.matmul %7, %2, %cst_6 {dimension_numbers = #tpu.dot_dimension_numbers<[1], [0], [0], [1], [0, 0, 1, 1], [], []>} : vector<128x8xf32>, vector<8x16xf32>, vector<128x16xf32> -> vector<128x16xf32>
    %9 = vector.shape_cast %8 : vector<128x16xf32> to vector<8x16x16xf32>
    %c0_7 = arith.constant 0 : index
    %c0_8 = arith.constant 0 : index
    %c0_9 = arith.constant 0 : index
    %10 = vector.load %arg5[%c0_7, %c0_8, %c0_9] : memref<8x16x16xf32, #tpu.memory_space<vmem>>, vector<8x16x16xf32>
    tpu.vector_store %arg5[%c0_7, %c0_8, %c0_9], %9 {strides = array<i32>} : memref<8x16x16xf32, #tpu.memory_space<vmem>>, vector<8x16x16xf32>,
    return
  }
  func.func @transform_0(%arg0: i32, %arg1: i32) -> (i32, i32, i32) {
    %c0_i32 = arith.constant 0 : i32
    %c0_i32_0 = arith.constant 0 : i32
    %c0_i32_1 = arith.constant 0 : i32
    return %arg0, %c0_i32, %c0_i32_0 : i32, i32, i32
  }
  func.func @transform_1(%arg0: i32, %arg1: i32) -> (i32, i32) {
    %c0_i32 = arith.constant 0 : i32
    %c0_i32_0 = arith.constant 0 : i32
    return %arg1, %c0_i32 : i32, i32
  }
  func.func @transform_2(%arg0: i32, %arg1: i32) -> (i32, i32) {
    %c0_i32 = arith.constant 0 : i32
    %c0_i32_0 = arith.constant 0 : i32
    %c0_i32_1 = arith.constant 0 : i32
    return %c0_i32, %c0_i32_0 : i32, i32
  }
  func.func @transform_3(%arg0: i32, %arg1: i32) -> (i32, i32, i32) {
    %c0_i32 = arith.constant 0 : i32
    %c0_i32_0 = arith.constant 0 : i32
    return %arg0, %arg1, %c0_i32 : i32, i32, i32
  }
}

</mosaic_0001>

<bundles_post_ra>
// kernel: tpu_custom_call.1
= control target key start
LH: loop header
LB: loop body
LE: loop exit
PB: predicated region body
PF: predicated region fallthrough
CT: control target
= control target key end

     0   :  { %8 = vsyncpa [#allocation3], 0  ;;  %s1178_s0 = inlined_call_operand.hbm [shape: f32[8,8,8], index: 0, kind: input, shape index: {}]   ;;  %s1179_s1 = inlined_call_operand.vmem [shape: f32[16,8], index: 1, kind: input, shape index: {}]   ;;  %s1180_s2 = inlined_call_operand.vmem [shape: f32[8,16], index: 2, kind: input, shape index: {}]   ;;  %s1181_s3 = inlined_call_operand.hbm [shape: f32[8,16,16], index: 3, kind: output, shape index: {}]  }
   0x1   :  { %9 = vsyncpa [#allocation4], 0  ;;  %s1067_s12 = smov [#allocation2]   ;;  %s1019_s16 = scalar_lea.hbm %s1178_s0, 1024 }
   0x2   :  { %s15_s13 = sshll.u32 %s1067_s12, 4  ;;  %p1020_p0 = scmp.ne.s32.totalorder %s1178_s0, %s1019_s16  ;;  %s16_s13 = int_to_ptr.vmem [resolvable:$true] %s15_s13 }
   0x3   :  { %p1023_p1 = scmp.lt.u32.totalorder %s1019_s16, %s1178_s0 }
   0x5   :  { %p1025_p2 = pnand %p1023_p1, %p1020_p0 }
   0x7   :  { %1028 = shalt.err (!%p1025_p2)
}
   0x8   :  { %s1029_s21 = scalar_lea.vmem %s16_s13, 1024  ;;  %p1034_p4 = scmp.lt.s32.totalorder %s16_s13, %s16_s13 }
   0x9   :  { %p1030_p3 = scmp.ne.s32.totalorder %s16_s13, %s1029_s21  ;;  %p1035_p5 = scmp.lt.s32.totalorder %s1029_s21, %s1029_s21 }
   0xb   :  { %p1036_p6 = por %p1035_p5, %p1034_p4 }
   0xd   :  { %p1037_p7 = pnand %p1036_p6, %p1030_p3 }
   0xf   :  { %1040 = shalt.err (!%p1037_p7)
}
  0x10   :  { %s1068_s22 = smov 128   ;;  %s1069_s23 = smov 8  }
  0x11   :  { %21 = dma.hbm_to_vmem [thread:$0]  %s1178_s0, 1024, %s16_s13, [#allocation3], %s1068_s22, %s1068_s22, %s1069_s23  }
  0x12   :  { %1063 = dma.done.wait [#allocation3], 1024  }
  0x13   :  { %1064 = vsyncadd [#allocation3], 4294966272  ;;  %vm40_vm0 = vcmask 64512   ;;  %v29_v0 = vld [vmem:[#allocation2] sm:$0xff]  ;;  %v38_v2 = vld [vmem:[%s1179_s1 + $0x8] sm:$0xff]  ;;  %vm840_vm1 = vcmask 130048  }
  0x14   :  { %v37_v1 = vld [vmem:[%s1179_s1] sm:$0xff]  ;;  %947 = vmatprep.subr.mxu0 %v29_v0  ;;  %v31_v3 = vld [vmem:[#allocation2 + $0x10] sm:$0xff]  ;;  %v30_v4 = vld [vmem:[#allocation2 + $0x8] sm:$0xff] }
  0x15   :  { %949 = vmatprep.mubr.msk.f32.mxu0 %vm40_vm0, %v37_v1  ;;  %948 = vmatpush3.msra.mxu0 %v29_v0  ;;  %v32_v5 = vld [vmem:[#allocation2 + $0x18] sm:$0xff]  ;;  %v33_v6 = vld [vmem:[#allocation2 + $0x20] sm:$0xff]  ;;  %v34_v7 = vld [vmem:[#allocation2 + $0x28] sm:$0xff] }
  0x16   :  { %952 = vmatprep.subr.mxu1 %v30_v4  ;;  %950 = vmatmul.mubr.msk.f32.vlgmr.msra.gmra.mrb[0].mxu0 %vm40_vm0, %v38_v2  ;;  %v35_v8 = vld [vmem:[#allocation2 + $0x30] sm:$0xff]  ;;  %v36_v9 = vld [vmem:[#allocation2 + $0x38] sm:$0xff]  ;;  %v39_v10 = vld [vmem:[%s1180_s2] sm:$0xff]  ;;  %s1070_s2 = smov [#allocation5]  }
  0x17   :  { %957 = vmatprep.subr.mxu0 %v31_v3  ;;  %953 = vmatpush3.msra.mxu1 %v30_v4  ;;  %s862_s30 = sshll.u32 %s1070_s2, 4  ;;  %s863_s30 = int_to_ptr.vmem [resolvable:$true] %s862_s30 }
  0x18   :  { %958 = vmatpush3.msra.mxu0 %v31_v3  ;;  %954 = vmatprep.mubr.msk.f32.mxu1 %vm40_vm0, %v37_v1  ;;  %s1041_s4 = scalar_lea.vmem %s863_s30, 2048  ;;  %p1046_p9 = scmp.lt.s32.totalorder %s863_s30, %s863_s30 }
  0x19   :  { %959 = vmatprep.mubr.msk.f32.mxu0 %vm40_vm0, %v37_v1  ;;  %955 = vmatmul.mubr.msk.f32.vlgmr.msra.gmra.mrb[0].mxu1 %vm40_vm0, %v38_v2  ;;  %p1042_p8 = scmp.ne.s32.totalorder %s863_s30, %s1041_s4  ;;  %p1047_p10 = scmp.lt.s32.totalorder %s1041_s4, %s1041_s4 }
  0x1a   :  { %962 = vmatprep.subr.mxu1 %v32_v5  ;;  %960 = vmatmul.mubr.msk.f32.vlgmr.msra.gmra.mrb[2].mxu0 %vm40_vm0, %v38_v2 }
  0x1b   :  { %967 = vmatprep.subr.mxu0 %v33_v6  ;;  %963 = vmatpush3.msra.mxu1 %v32_v5  ;;  %p1048_p11 = por %p1047_p10, %p1046_p9 }
  0x1c   :  { %968 = vmatpush3.msra.mxu0 %v33_v6  ;;  %964 = vmatprep.mubr.msk.f32.mxu1 %vm40_vm0, %v37_v1 }
  0x1d   :  { %969 = vmatprep.mubr.msk.f32.mxu0 %vm40_vm0, %v37_v1  ;;  %965 = vmatmul.mubr.msk.f32.vlgmr.msra.gmra.mrb[2].mxu1 %vm40_vm0, %v38_v2  ;;  %p1049_p12 = pnand %p1048_p11, %p1042_p8 }
  0x1e   :  { %972 = vmatprep.subr.mxu1 %v34_v7  ;;  %970 = vmatmul.mubr.msk.f32.vlgmr.msra.gmra.mrb[4].mxu0 %vm40_vm0, %v38_v2 }
  0x1f   :  { %973 = vmatpush3.msra.mxu1 %v34_v7  ;;  %974 = vmatprep.mubr.msk.f32.mxu1 %vm40_vm0, %v37_v1 }
  0x20   :  { %977 = vmatprep.subr.mxu0 %v35_v8  ;;  %979 = vmatprep.mubr.msk.f32.mxu0 %vm40_vm0, %v37_v1 }
  0x21   :  { %978 = vmatpush3.msra.mxu0 %v35_v8  ;;  %975 = vmatmul.mubr.msk.f32.vlgmr.msra.gmra.mrb[4].mxu1 %vm40_vm0, %v38_v2 }
  0x22   :  { %982 = vmatprep.subr.mxu1 %v36_v9  ;;  %980 = vmatmul.mubr.msk.f32.vlgmr.msra.gmra.mrb[6].mxu0 %vm40_vm0, %v38_v2 }
  0x23   :  { %983 = vmatpush3.msra.mxu1 %v36_v9  ;;  %984 = vmatprep.mubr.msk.f32.mxu1 %vm40_vm0, %v37_v1 }
  0x24   :  { %987 = vmatprep.subr.mxu0 %v39_v10  ;;  %1013 = vmatprep.subr.mxu1 %v39_v10 }
  0x25   :  { %985 = vmatmul.mubr.msk.f32.vlgmr.msra.gmra.mrb[6].mxu1 %vm40_vm0, %v38_v2  ;;  %988 = vmatpush3.msra.mxu0 %v39_v10 }
  0x26   :  { %1014 = vmatpush3.msra.mxu1 %v39_v10 }
  0xe9   :  { %v951_v11 = vpop.f32.mrb[0].mxu0 }
  0xea   :  { %v113_v12 = vpop.f32.mrb[1].mxu0 }
  0xeb   :  { %989 = vmatprep.mubr.msk.f32.mxu0 %vm40_vm0, %v113_v12 }
  0xec   :  { %990 = vmatmul.mubr.msk.f32.vlgmr.msra.gmra.mrb[8].mxu0 %vm40_vm0, %v951_v11  ;;  %v956_v13 = vpop.f32.mrb[0].mxu1 }
  0xed   :  { %v961_v14 = vpop.f32.mrb[2].mxu0  ;;  %v188_v15 = vpop.f32.mrb[1].mxu1 }
  0xee   :  { %v263_v16 = vpop.f32.mrb[3].mxu0  ;;  %992 = vmatprep.mubr.msk.f32.mxu0 %vm40_vm0, %v188_v15 }
  0xf0   :  { %993 = vmatmul.mubr.msk.f32.gmra.mrb[10].mxu0 %vm40_vm0, %v956_v13  ;;  %v966_v17 = vpop.f32.mrb[2].mxu1 }
  0xf1   :  { %v971_v18 = vpop.f32.mrb[4].mxu0  ;;  %995 = vmatprep.mubr.msk.f32.mxu0 %vm40_vm0, %v263_v16  ;;  %v338_v19 = vpop.f32.mrb[3].mxu1 }
  0xf2   :  { %v413_v20 = vpop.f32.mrb[5].mxu0 }
  0xf3   :  { %1001 = vmatprep.mubr.msk.f32.mxu1 %vm40_vm0, %v413_v20 }
  0xf4   :  { %996 = vmatmul.mubr.msk.f32.gmra.mrb[12].mxu0 %vm40_vm0, %v961_v14  ;;  %1002 = vmatmul.mubr.msk.f32.vlgmr.msra.gmra.mrb[8].mxu1 %vm40_vm0, %v971_v18  ;;  %v976_v21 = vpop.f32.mrb[4].mxu1 }
  0xf5   :  { %998 = vmatprep.mubr.msk.f32.mxu0 %vm40_vm0, %v338_v19  ;;  %v488_v22 = vpop.f32.mrb[5].mxu1  ;;  %v981_v23 = vpop.f32.mrb[6].mxu0 }
  0xf6   :  { %1004 = vmatprep.mubr.msk.f32.mxu1 %vm40_vm0, %v488_v22  ;;  %v563_v24 = vpop.f32.mrb[7].mxu0 }
  0xf8   :  { %999 = vmatmul.mubr.msk.f32.gmra.mrb[14].mxu0 %vm40_vm0, %v966_v17  ;;  %1005 = vmatmul.mubr.msk.f32.gmra.mrb[10].mxu1 %vm40_vm0, %v976_v21  ;;  %v986_v25 = vpop.f32.mrb[6].mxu1 }
  0xf9   :  { %1007 = vmatprep.mubr.msk.f32.mxu1 %vm40_vm0, %v563_v24  ;;  %v638_v26 = vpop.f32.mrb[7].mxu1 }
  0xfc   :  { %1008 = vmatmul.mubr.msk.f32.gmra.mrb[12].mxu1 %vm40_vm0, %v981_v23 }
  0xfd   :  { %1010 = vmatprep.mubr.msk.f32.mxu1 %vm40_vm0, %v638_v26 }
 0x100   :  { %1011 = vmatmul.mubr.msk.f32.gmra.mrb[14].mxu1 %vm40_vm0, %v986_v25 }
 0x1bf   :  { %v991_v27 = vpop.f32.mrb[8].mxu0 }
 0x1c0   :  { %842 = vst.msk [vmem:[#allocation5 + $0x8] sm:$0xff] %vm840_vm1, %v991_v27  ;;  %v761_v28 = vpop.f32.mrb[9].mxu0 }
 0x1c1   :  { %841 = vst.msk [vmem:[#allocation5] sm:$0xff] %vm840_vm1, %v761_v28 }
 0x1c3   :  { %v994_v29 = vpop.f32.mrb[10].mxu0 }
 0x1c4   :  { %844 = vst.msk [vmem:[#allocation5 + $0x18] sm:$0xff] %vm840_vm1, %v994_v29  ;;  %v771_v30 = vpop.f32.mrb[11].mxu0 }
 0x1c5   :  { %843 = vst.msk [vmem:[#allocation5 + $0x10] sm:$0xff] %vm840_vm1, %v771_v30 }
 0x1c7   :  { %v997_v31 = vpop.f32.mrb[12].mxu0  ;;  %v1003_v32 = vpop.f32.mrb[8].mxu1 }
 0x1c8   :  { %846 = vst.msk [vmem:[#allocation5 + $0x28] sm:$0xff] %vm840_vm1, %v997_v31  ;;  %850 = vst.msk [vmem:[#allocation5 + $0x48] sm:$0xff] %vm840_vm1, %v1003_v32  ;;  %v781_v33 = vpop.f32.mrb[13].mxu0  ;;  %v801_v34 = vpop.f32.mrb[9].mxu1 }
 0x1c9   :  { %845 = vst.msk [vmem:[#allocation5 + $0x20] sm:$0xff] %vm840_vm1, %v781_v33  ;;  %849 = vst.msk [vmem:[#allocation5 + $0x40] sm:$0xff] %vm840_vm1, %v801_v34 }
 0x1cb   :  { %v1000_v35 = vpop.f32.mrb[14].mxu0  ;;  %v1006_v36 = vpop.f32.mrb[10].mxu1 }
 0x1cc   :  { %848 = vst.msk [vmem:[#allocation5 + $0x38] sm:$0xff] %vm840_vm1, %v1000_v35  ;;  %852 = vst.msk [vmem:[#allocation5 + $0x58] sm:$0xff] %vm840_vm1, %v1006_v36  ;;  %v791_v37 = vpop.f32.mrb[15].mxu0  ;;  %v811_v38 = vpop.f32.mrb[11].mxu1 }
 0x1cd   :  { %847 = vst.msk [vmem:[#allocation5 + $0x30] sm:$0xff] %vm840_vm1, %v791_v37  ;;  %851 = vst.msk [vmem:[#allocation5 + $0x50] sm:$0xff] %vm840_vm1, %v811_v38 }
 0x1cf   :  { %v1009_v39 = vpop.f32.mrb[12].mxu1 }
 0x1d0   :  { %854 = vst.msk [vmem:[#allocation5 + $0x68] sm:$0xff] %vm840_vm1, %v1009_v39  ;;  %v821_v40 = vpop.f32.mrb[13].mxu1 }
 0x1d1   :  { %853 = vst.msk [vmem:[#allocation5 + $0x60] sm:$0xff] %vm840_vm1, %v821_v40 }
 0x1d3   :  { %v1012_v41 = vpop.f32.mrb[14].mxu1 }
 0x1d4   :  { %856 = vst.msk [vmem:[#allocation5 + $0x78] sm:$0xff] %vm840_vm1, %v1012_v41  ;;  %v831_v42 = vpop.f32.mrb[15].mxu1 }
 0x1d5   :  { %855 = vst.msk [vmem:[#allocation5 + $0x70] sm:$0xff] %vm840_vm1, %v831_v42 }
 0x1d6   :  { %1052 = shalt.err (!%p1049_p12)
}
 0x1d7   :  { %s1053_s7 = scalar_lea.hbm %s1181_s3, 2048 }
 0x1d8   :  { %p1054_p13 = scmp.ne.s32.totalorder %s1181_s3, %s1053_s7  ;;  %p1057_p0 = scmp.lt.u32.totalorder %s1053_s7, %s1181_s3 }
 0x1da   :  { %p1059_p1 = pnand %p1057_p0, %p1054_p13 }
 0x1dc   :  { %1062 = shalt.err (!%p1059_p1)
}
 0x1dd   :  { %868 = dma.vmem_to_hbm [thread:$0]  %s863_s30, 2048, %s1181_s3, [#allocation4], %s1068_s22, %s1068_s22, %s1069_s23  }
 0x1de   :  { %1065 = dma.done.wait [#allocation4], 2048  }
 0x1df   :  { %1066 = vsyncadd [#allocation4], 4294965248 }
 0x1e0   :  { %872 = vsyncpa [#allocation3], 1 }
 0x1e1   :  { %873 = vsyncpa [#allocation4], 1 }

</bundles_post_ra>
